<compile_context>
chip_gen: v7x
topology: tpu7x:2x2x1
jax: 0.10.0
libtpu: 0.0.40
codegen_flags: <defaults>
</compile_context>

<pallas_src>
import functools

import jax
import jax.numpy as jnp
from jax.experimental import pallas as pl
from jax.experimental.pallas import tpu as pltpu


# ----------------------------- kernels --------------------------------------

def _sigmoid(x):
    # exp on the EUP; one exact VALU divide (fully hidden: kernel is HBM-bound).
    return 1.0 / (1.0 + jnp.exp(-x))


def _ctr_kernel(u_ref, i_ref, o_ref):
    # Inputs arrive in natural (TB, D) layout; transpose on the XLU so the
    # batch sits on the 128-wide lane axis -> sublane reduce + lane-dense out.
    u_t = u_ref[...].T                                        # (D, TB)
    i_t = i_ref[...].T                                        # (D, TB)
    s = jnp.sum(u_t * i_t, axis=0, keepdims=True)             # (1, TB)
    o_ref[...] = _sigmoid(s)


def _cvr_body(u_t, i_t, w1u_ref, w1i_ref, b1_ref, w2_ref, b2_ref):
    # cvr = sigmoid( w2 . relu( W1u @ uT + W1i @ iT + b1 ) + b2 )
    # cat(u, i) @ W1.T == W1u @ uT + W1i @ iT  -> no in-kernel concat needed.
    h = (jnp.dot(w1u_ref[...], u_t, preferred_element_type=jnp.float32)
         + jnp.dot(w1i_ref[...], i_t, preferred_element_type=jnp.float32)
         + b1_ref[...])                                       # (H, TB)
    h = jnp.maximum(h, 0.0)
    # Second linear (H -> 1): VPU multiply + sublane reduce, no MXU pass.
    z = jnp.sum(h * w2_ref[...], axis=0, keepdims=True) + b2_ref[...]  # (1, TB)
    return _sigmoid(z)


def _cvr_kernel(u_ref, i_ref, w1u_ref, w1i_ref, b1_ref, w2_ref, b2_ref, o_ref):
    u_t = u_ref[...].T
    i_t = i_ref[...].T
    o_ref[...] = _cvr_body(u_t, i_t, w1u_ref, w1i_ref, b1_ref, w2_ref, b2_ref)


def _both_kernel(u_ref, i_ref, w1u_ref, w1i_ref, b1_ref, w2_ref, b2_ref,
                 ctr_ref, cvr_ref):
    # Fused ctr+cvr: the embedding tiles are read from HBM once.
    u_t = u_ref[...].T
    i_t = i_ref[...].T
    ctr_ref[...] = _sigmoid(jnp.sum(u_t * i_t, axis=0, keepdims=True))
    cvr_ref[...] = _cvr_body(u_t, i_t, w1u_ref, w1i_ref, b1_ref, w2_ref, b2_ref)


# ----------------------------- wrapper ---------------------------------------

def _effective_tile(batch, tile_b):
    """Largest tile <= tile_b (multiple of 128) that still leaves >=2 grid
    steps when the batch allows it (v7x megacore) and never over-pads tiny
    batches past one 128-lane tile."""
    b_units = pl.cdiv(batch, 128)
    max_units = max(1, tile_b // 128)
    if b_units <= 1:
        return 128
    return min(max_units, max(1, (b_units + 1) // 2)) * 128


@functools.partial(jax.jit, static_argnames=("task", "tile_b"))
def pda_forward(params, user_idx, item_idx, task, tile_b=512):
    """Replicates PDA.forward(userIdx, itemIdx, task).

    task: "ctr" | "cvr" | "both" (fused, returns (ctr, cvr)).
    Returns (B,) f32 array(s).
    """
    B = user_idx.shape[0]
    D = params["uEmbed"].shape[1]
    H = params["cvr_b"].shape[0]

    tile_eff = _effective_tile(B, tile_b)
    num_tiles = pl.cdiv(B, tile_eff)
    b_pad = num_tiles * tile_eff
    pad = b_pad - B
    uidx = jnp.pad(user_idx, (0, pad))          # pad with valid index 0
    iidx = jnp.pad(item_idx, (0, pad))          # padded lanes sliced off below

    # Row gather stays in the wrapper (glue); slabs keep their natural
    # (B_pad, D) layout — no extra HBM transpose pass.
    u = jnp.take(params["uEmbed"], uidx, axis=0)    # (B_pad, D)
    i = jnp.take(params["iEmbed"], iidx, axis=0)    # (B_pad, D)

    grid = (num_tiles,)
    emb_spec = pl.BlockSpec((tile_eff, D), lambda b: (b, 0))
    out_spec = pl.BlockSpec((1, tile_eff), lambda b: (0, b))
    const = lambda shape: pl.BlockSpec(shape, lambda b: (0, 0))
    out_sds = jax.ShapeDtypeStruct((1, b_pad), jnp.float32)
    cparams = pltpu.CompilerParams(
        dimension_semantics=("parallel",),
        vmem_limit_bytes=32 * 1024 * 1024,
    )

    if task == "ctr":
        out = pl.pallas_call(
            _ctr_kernel,
            out_shape=out_sds,
            grid=grid,
            in_specs=[emb_spec, emb_spec],
            out_specs=out_spec,
            compiler_params=cparams,
        )(u, i)
        return out[0, :B]

    # Weights/biases are VMEM-resident across the batch grid (constant
    # index_map), so they are DMA'd once per call.
    w_specs = [const((H, D)), const((H, D)), const((H, 1)),
               const((H, 1)), const((1, 1))]
    w_args = (params["cvr_Wu"], params["cvr_Wi"], params["cvr_b"],
              params["cvr1_W"], params["cvr1_b"])

    if task == "cvr":
        out = pl.pallas_call(
            _cvr_kernel,
            out_shape=out_sds,
            grid=grid,
            in_specs=[emb_spec, emb_spec] + w_specs,
            out_specs=out_spec,
            compiler_params=cparams,
        )(u, i, *w_args)
        return out[0, :B]

    if task == "both":
        ctr_o, cvr_o = pl.pallas_call(
            _both_kernel,
            out_shape=(out_sds, out_sds),
            grid=grid,
            in_specs=[emb_spec, emb_spec] + w_specs,
            out_specs=[out_spec, out_spec],
            compiler_params=cparams,
        )(u, i, *w_args)
        return ctr_o[0, :B], cvr_o[0, :B]

    raise ValueError(f"unknown task: {task}")


# ----------------------------- param init -----------------------------------

def init_params(key, user_num, item_num, dim, hidden=64):
    ks = jax.random.split(key, 6)
    # nn.init.normal_(std=0.01) for the embedding tables.
    u_embed = 0.01 * jax.random.normal(ks[0], (user_num, dim), jnp.float32)
    i_embed = 0.01 * jax.random.normal(ks[1], (item_num, dim), jnp.float32)
    # nn.Linear(2*dim, 64): weight (64, 2*dim), init U(-1/sqrt(2*dim), ...).
    lim1 = 1.0 / jnp.sqrt(2.0 * dim)
    w1 = jax.random.uniform(ks[2], (hidden, 2 * dim), jnp.float32, -lim1, lim1)
    b1 = jax.random.uniform(ks[3], (hidden, 1), jnp.float32, -lim1, lim1)
    # nn.Linear(64, 1): weight (1, 64) stored transposed as (64, 1).
    lim2 = 1.0 / jnp.sqrt(float(hidden))
    w2 = jax.random.uniform(ks[4], (hidden, 1), jnp.float32, -lim2, lim2)
    b2 = jax.random.uniform(ks[5], (1, 1), jnp.float32, -lim2, lim2)
    return {
        "uEmbed": u_embed,
        "iEmbed": i_embed,
        "cvr_Wu": w1[:, :dim],     # (H, D): user half of cat(u, i) weight
        "cvr_Wi": w1[:, dim:],     # (H, D): item half
        "cvr_b": b1,               # (H, 1)
        "cvr1_W": w2,              # (H, 1)
        "cvr1_b": b2,              # (1, 1)
    }


# ----------------------------- demo / check ---------------------------------

if __name__ == "__main__":
    user_num, item_num, dim, batch = 50, 60, 32, 8

    key = jax.random.PRNGKey(0)
    pkey, ukey, ikey = jax.random.split(key, 3)
    params = init_params(pkey, user_num, item_num, dim)

    user_idx = jax.random.randint(ukey, (batch,), 0, user_num, dtype=jnp.int32)
    item_idx = jax.random.randint(ikey, (batch,), 0, item_num, dtype=jnp.int32)

    ctr = pda_forward(params, user_idx, item_idx, "ctr")
    cvr = pda_forward(params, user_idx, item_idx, "cvr")
    ctr_f, cvr_f = pda_forward(params, user_idx, item_idx, "both")
    jax.block_until_ready((ctr, cvr, ctr_f, cvr_f))

    # pure-JAX reference check.
    u = jnp.take(params["uEmbed"], user_idx, axis=0)
    i = jnp.take(params["iEmbed"], item_idx, axis=0)
    ctr_ref = jax.nn.sigmoid(jnp.sum(u * i, axis=1))
    w1_full = jnp.concatenate([params["cvr_Wu"], params["cvr_Wi"]], axis=1)
    h_ref = jax.nn.relu(jnp.concatenate([u, i], axis=1) @ w1_full.T
                        + params["cvr_b"][:, 0])
    cvr_ref = jax.nn.sigmoid(h_ref @ params["cvr1_W"][:, 0]
                             + params["cvr1_b"][0, 0])

    assert ctr.shape == (batch,) and cvr.shape == (batch,)
    assert jnp.allclose(ctr, ctr_ref, atol=1e-4), (ctr, ctr_ref)
    assert jnp.allclose(cvr, cvr_ref, atol=1e-4), (cvr, cvr_ref)
    assert jnp.allclose(ctr_f, ctr_ref, atol=1e-4), (ctr_f, ctr_ref)
    assert jnp.allclose(cvr_f, cvr_ref, atol=1e-4), (cvr_f, cvr_ref)

    print("KERNEL_OK")
</pallas_src>

<mosaic_0001>
module attributes {stable_mosaic.version = 11 : i64} {
  func.func @_ctr_kernel(%arg0: i32, %arg1: memref<128x32xf32, #tpu.memory_space<vmem>>, %arg2: memref<128x32xf32, #tpu.memory_space<vmem>>, %arg3: memref<1x128xf32, #tpu.memory_space<vmem>>) attributes {dimension_semantics = [#tpu.dimension_semantics<parallel>], iteration_bounds = array<i64: 1>, scalar_prefetch = 0 : i64, scratch_operands = 0 : i64, tpu.core_type = #tpu.core_type<tc>, window_params = [{transform_indices = @transform_0, window_bounds = array<i64: 128, 32>}, {transform_indices = @transform_1, window_bounds = array<i64: 128, 32>}, {transform_indices = @transform_2, window_bounds = array<i64: 1, 128>}]} {
    %c0 = arith.constant 0 : index
    %c0_0 = arith.constant 0 : index
    %0 = vector.load %arg1[%c0, %c0_0] : memref<128x32xf32, #tpu.memory_space<vmem>>, vector<128x32xf32>
    %1 = tpu.transpose %0, [1, 0] : vector<128x32xf32> -> vector<32x128xf32>
    %c0_1 = arith.constant 0 : index
    %c0_2 = arith.constant 0 : index
    %2 = vector.load %arg2[%c0_1, %c0_2] : memref<128x32xf32, #tpu.memory_space<vmem>>, vector<128x32xf32>
    %3 = tpu.transpose %2, [1, 0] : vector<128x32xf32> -> vector<32x128xf32>
    %4 = arith.mulf %1, %3 : vector<32x128xf32>
    %cst = arith.constant dense<0.000000e+00> : vector<128xf32>
    %5 = vector.multi_reduction <add>, %4, %cst [0] : vector<32x128xf32> to vector<128xf32>
    %6 = vector.shape_cast %5 : vector<128xf32> to vector<1x128xf32>
    %cst_3 = arith.constant 0.000000e+00 : f32
    %7 = vector.broadcast %cst_3 : f32 to vector<1x128xf32>
    %8 = arith.subf %7, %6 : vector<1x128xf32>
    %9 = math.exp %8 : vector<1x128xf32>
    %cst_4 = arith.constant 1.000000e+00 : f32
    %10 = vector.broadcast %cst_4 : f32 to vector<1x128xf32>
    %11 = arith.addf %10, %9 : vector<1x128xf32>
    %cst_5 = arith.constant 1.000000e+00 : f32
    %12 = vector.broadcast %cst_5 : f32 to vector<1x128xf32>
    %13 = arith.divf %12, %11 : vector<1x128xf32>
    %c0_6 = arith.constant 0 : index
    %c0_7 = arith.constant 0 : index
    %14 = vector.load %arg3[%c0_6, %c0_7] : memref<1x128xf32, #tpu.memory_space<vmem>>, vector<1x128xf32>
    tpu.vector_store %arg3[%c0_6, %c0_7], %13 {strides = array<i32>} : memref<1x128xf32, #tpu.memory_space<vmem>>, vector<1x128xf32>,
    return
  }
  func.func @transform_0(%arg0: i32) -> (i32, i32) {
    %c0_i32 = arith.constant 0 : i32
    %c0_i32_0 = arith.constant 0 : i32
    return %arg0, %c0_i32 : i32, i32
  }
  func.func @transform_1(%arg0: i32) -> (i32, i32) {
    %c0_i32 = arith.constant 0 : i32
    %c0_i32_0 = arith.constant 0 : i32
    return %arg0, %c0_i32 : i32, i32
  }
  func.func @transform_2(%arg0: i32) -> (i32, i32) {
    %c0_i32 = arith.constant 0 : i32
    %c0_i32_0 = arith.constant 0 : i32
    return %c0_i32, %arg0 : i32, i32
  }
}

</mosaic_0001>

<bundles_post_ra>
// kernel: pda_forward.1
= control target key start
LH: loop header
LB: loop body
LE: loop exit
PB: predicated region body
PF: predicated region fallthrough
CT: control target
= control target key end

     0   :  { %s249_s1 = inlined_call_operand.vmem [shape: f32[128,32], index: 1, kind: input, shape index: {}]   ;;  %s250_s0 = inlined_call_operand.vmem [shape: f32[128,32], index: 0, kind: input, shape index: {}]   ;;  %s251_s2 = inlined_call_operand.vmem [shape: f32[1,128], index: 2, kind: output, shape index: {}]  }
   0x1   :  { %v59_v0 = vld [vmem:[%s249_s1] sm:$0xff]  ;;  %v60_v2 = vld [vmem:[%s249_s1 + $0x8] sm:$0xff]  ;;  %v61_v4 = vld [vmem:[%s249_s1 + $0x10] sm:$0xff] }
   0x2   :  { %v11_v1 = vld [vmem:[%s250_s0] sm:$0xff]  ;;  %75 = vxpose.xlu1.b32.start [1/16] (narrow) %v59_v0, 32  ;;  %v12_v3 = vld [vmem:[%s250_s0 + $0x8] sm:$0xff]  ;;  %v13_v5 = vld [vmem:[%s250_s0 + $0x10] sm:$0xff] }
   0x3   :  { %27 = vxpose.xlu0.b32.start [1/16] (narrow) %v11_v1, 32  ;;  %v62_v6 = vld [vmem:[%s249_s1 + $0x18] sm:$0xff]  ;;  %v63_v8 = vld [vmem:[%s249_s1 + $0x20] sm:$0xff]  ;;  %v64_v10 = vld [vmem:[%s249_s1 + $0x28] sm:$0xff] }
   0x4   :  { %v14_v7 = vld [vmem:[%s250_s0 + $0x18] sm:$0xff]  ;;  %v15_v9 = vld [vmem:[%s250_s0 + $0x20] sm:$0xff]  ;;  %v16_v11 = vld [vmem:[%s250_s0 + $0x28] sm:$0xff] }
   0x5   :  { %v65_v12 = vld [vmem:[%s249_s1 + $0x30] sm:$0xff]  ;;  %v66_v14 = vld [vmem:[%s249_s1 + $0x38] sm:$0xff]  ;;  %v67_v16 = vld [vmem:[%s249_s1 + $0x40] sm:$0xff] }
   0x6   :  { %76 = vxpose.xlu1.b32.cont [2/16] (narrow) %v60_v2, 32  ;;  %v17_v13 = vld [vmem:[%s250_s0 + $0x30] sm:$0xff]  ;;  %v18_v15 = vld [vmem:[%s250_s0 + $0x38] sm:$0xff]  ;;  %v19_v17 = vld [vmem:[%s250_s0 + $0x40] sm:$0xff] }
   0x7   :  { %28 = vxpose.xlu0.b32.cont [2/16] (narrow) %v12_v3, 32  ;;  %v68_v18 = vld [vmem:[%s249_s1 + $0x48] sm:$0xff]  ;;  %v69_v20 = vld [vmem:[%s249_s1 + $0x50] sm:$0xff]  ;;  %v70_v22 = vld [vmem:[%s249_s1 + $0x58] sm:$0xff] }
   0x8   :  { %v20_v19 = vld [vmem:[%s250_s0 + $0x48] sm:$0xff]  ;;  %v21_v21 = vld [vmem:[%s250_s0 + $0x50] sm:$0xff]  ;;  %v22_v23 = vld [vmem:[%s250_s0 + $0x58] sm:$0xff] }
   0x9   :  { %v71_v24 = vld [vmem:[%s249_s1 + $0x60] sm:$0xff]  ;;  %v72_v26 = vld [vmem:[%s249_s1 + $0x68] sm:$0xff]  ;;  %v73_v28 = vld [vmem:[%s249_s1 + $0x70] sm:$0xff] }
   0xa   :  { %77 = vxpose.xlu1.b32.cont [3/16] (narrow) %v61_v4, 32  ;;  %v23_v25 = vld [vmem:[%s250_s0 + $0x60] sm:$0xff]  ;;  %v24_v27 = vld [vmem:[%s250_s0 + $0x68] sm:$0xff]  ;;  %v25_v29 = vld [vmem:[%s250_s0 + $0x70] sm:$0xff] }
   0xb   :  { %29 = vxpose.xlu0.b32.cont [3/16] (narrow) %v13_v5, 32  ;;  %v74_v30 = vld [vmem:[%s249_s1 + $0x78] sm:$0xff] }
   0xc   :  { %v26_v31 = vld [vmem:[%s250_s0 + $0x78] sm:$0xff] }
   0xe   :  { %78 = vxpose.xlu1.b32.cont [4/16] (narrow) %v62_v6, 32 }
   0xf   :  { %30 = vxpose.xlu0.b32.cont [4/16] (narrow) %v14_v7, 32 }
  0x12   :  { %79 = vxpose.xlu1.b32.cont [5/16] (narrow) %v63_v8, 32 }
  0x13   :  { %31 = vxpose.xlu0.b32.cont [5/16] (narrow) %v15_v9, 32 }
  0x16   :  { %80 = vxpose.xlu1.b32.cont [6/16] (narrow) %v64_v10, 32 }
  0x17   :  { %32 = vxpose.xlu0.b32.cont [6/16] (narrow) %v16_v11, 32 }
  0x1a   :  { %81 = vxpose.xlu1.b32.cont [7/16] (narrow) %v65_v12, 32 }
  0x1b   :  { %33 = vxpose.xlu0.b32.cont [7/16] (narrow) %v17_v13, 32 }
  0x1e   :  { %82 = vxpose.xlu1.b32.cont [8/16] (narrow) %v66_v14, 32 }
  0x1f   :  { %34 = vxpose.xlu0.b32.cont [8/16] (narrow) %v18_v15, 32 }
  0x22   :  { %83 = vxpose.xlu1.b32.cont [9/16] (narrow) %v67_v16, 32 }
  0x23   :  { %35 = vxpose.xlu0.b32.cont [9/16] (narrow) %v19_v17, 32 }
  0x26   :  { %84 = vxpose.xlu1.b32.cont [10/16] (narrow) %v68_v18, 32 }
  0x27   :  { %36 = vxpose.xlu0.b32.cont [10/16] (narrow) %v20_v19, 32 }
  0x2a   :  { %85 = vxpose.xlu1.b32.cont [11/16] (narrow) %v69_v20, 32 }
  0x2b   :  { %37 = vxpose.xlu0.b32.cont [11/16] (narrow) %v21_v21, 32 }
  0x2e   :  { %86 = vxpose.xlu1.b32.cont [12/16] (narrow) %v70_v22, 32 }
  0x2f   :  { %38 = vxpose.xlu0.b32.cont [12/16] (narrow) %v22_v23, 32 }
  0x32   :  { %87 = vxpose.xlu1.b32.cont [13/16] (narrow) %v71_v24, 32 }
  0x33   :  { %39 = vxpose.xlu0.b32.cont [13/16] (narrow) %v23_v25, 32 }
  0x36   :  { %88 = vxpose.xlu1.b32.cont [14/16] (narrow) %v72_v26, 32 }
  0x37   :  { %40 = vxpose.xlu0.b32.cont [14/16] (narrow) %v24_v27, 32 }
  0x3a   :  { %89 = vxpose.xlu1.b32.cont [15/16] (narrow) %v73_v28, 32 }
  0x3b   :  { %41 = vxpose.xlu0.b32.cont [15/16] (narrow) %v25_v29, 32 }
  0x3e   :  { %90 = vxpose.xlu1.b32.end [16/16] (narrow) %v74_v30, 32 }
  0x3f   :  { %42 = vxpose.xlu0.b32.end [16/16] (narrow) %v26_v31, 32 }
  0x82   :  { %v91_v32 = vpop.trf.xlu1 }
  0x83   :  { %v43_v33 = vpop.trf.xlu0 }
  0x84   :  { %v107_v39 = vmul.f32 %v91_v32, %v43_v33 }
  0x86   :  { %v92_v34 = vpop.trf.xlu1 }
  0x87   :  { %v44_v35 = vpop.trf.xlu0 }
  0x88   :  { %v108_v36 = vmul.f32 %v92_v34, %v44_v35 }
  0x8a   :  { %v93_v37 = vpop.trf.xlu1  ;;  %v111_v41 = vadd.f32 %v108_v36, %v107_v39 }
  0x8b   :  { %v45_v38 = vpop.trf.xlu0 }
  0x8c   :  { %v109_v40 = vmul.f32 %v93_v37, %v45_v38 }
  0x8e   :  { %v94_v42 = vpop.trf.xlu1  ;;  %v112_v44 = vadd.f32 %v111_v41, %v109_v40 }
  0x8f   :  { %v46_v43 = vpop.trf.xlu0 }
  0x90   :  { %v110_v45 = vmul.f32 %v94_v42, %v46_v43 }
  0x92   :  { %v113_v46 = vadd.f32 %v112_v44, %v110_v45 }
  0x94   :  { %v114_v47 = vrot.slane %v113_v46, 4 }
  0x96   :  { %v115_v48 = vadd.f32 %v114_v47, %v113_v46 }
  0x98   :  { %v116_v49 = vrot.slane %v115_v48, 2 }
  0x9a   :  { %v117_v50 = vadd.f32 %v116_v49, %v115_v48 }
  0x9c   :  { %v118_v51 = vrot.slane %v117_v50, 1 }
  0x9e   :  { %v119_v52 = vadd.f32 %v118_v51, %v117_v50 }
  0xa0   :  { %v120_v53 = vsub.f32 0.0, %v119_v52 }
  0xa2   :  { %v121_v54 = vmul.f32 1.442695, %v120_v53 }
  0xa4   :  { %131 = vpow2.f32 %v121_v54 }
  0xae   :  { %v132_v55 = vpop.eup %131 }
  0xaf   :  { %v123_v56 = vadd.f32 1.0, %v132_v55 }
  0xb1   :  { %133 = vrcp.f32 %v123_v56 }
  0xbb   :  { %v134_v57 = vpop.eup %133 }
  0xbc   :  { %126 = vst [vmem:[%s251_s2] sm:$0x1] %v134_v57 }

</bundles_post_ra>
